<compile_context>
chip_gen: v7x
topology: tpu7x:2x2x1
jax: 0.10.0
libtpu: 0.0.40
codegen_flags: <defaults>
</compile_context>

<pallas_src>
import functools
import math

import jax
import jax.numpy as jnp
from jax.experimental import pallas as pl
from jax.experimental.pallas import tpu as pltpu


def _round_up(x, m):
    return ((x + m - 1) // m) * m


def _gelu_exact(x):
    # torch.nn.GELU() default: exact erf formulation (kept in f32)
    return 0.5 * x * (1.0 + jax.lax.erf(x * (1.0 / math.sqrt(2.0))))


def _softplus(x):
    # numerically-stable softplus: max(x,0) + log1p(exp(-|x|))
    return jnp.maximum(x, 0.0) + jnp.log1p(jnp.exp(-jnp.abs(x)))


def _device_kind():
    try:
        return jax.devices()[0].device_kind.lower()
    except Exception:
        return ""


def encoder_kernel(x_ref, w1_ref, b1_ref, w2_ref, b2_ref, w3_ref, b3_ref,
                   out_ref, *, z_dim_p):
    compute_dtype = w1_ref.dtype

    # x arrives as f32 (no extra padded+cast HBM pass in the wrapper);
    # the bf16 cast is cheap VPU work hidden under the MXU.
    x = x_ref[...].astype(compute_dtype)

    # layer 1: bf16 x bf16 -> f32 accumulate, f32 bias, exact GELU in f32
    h1 = jnp.dot(x, w1_ref[...], preferred_element_type=jnp.float32) + b1_ref[...]
    h1 = _gelu_exact(h1)
    # Dropout(p=0.05) -> identity at inference
    # TODO(synk): training-mode dropout (Bernoulli masks via pltpu.prng_*) not implemented.

    # layer 2
    h2 = jnp.dot(h1.astype(compute_dtype), w2_ref[...],
                 preferred_element_type=jnp.float32) + b2_ref[...]
    h2 = _gelu_exact(h2)

    # layer 3: fused mu|var head, packed per-head on 128-lane boundaries:
    #   columns [0, z_dim_p)         -> mu   (identity)
    #   columns [z_dim_p, 2*z_dim_p) -> var  (softplus + 1e-6)
    # No per-element mask; softplus only touches the variance half.
    y = jnp.dot(h2.astype(compute_dtype), w3_ref[...],
                preferred_element_type=jnp.float32) + b3_ref[...]
    out_ref[:, :z_dim_p] = y[:, :z_dim_p].astype(out_ref.dtype)
    out_ref[:, z_dim_p:] = (_softplus(y[:, z_dim_p:]) + 1e-6).astype(out_ref.dtype)


def _pad_feature(d, align_256):
    """Pad a contraction-side feature dim to 128; bump to 256 on 256x256-MXU
    generations when 128-padding would leave a trailing half-width block."""
    p = _round_up(d, 128)
    if align_256 and p >= 256 and p % 256:
        p = _round_up(p, 256)
    return p


def _choose_tm(batch, hid_p, multi_core):
    """Row tile. Single-TC (v5e/v6e): one big tile (fewer per-step overheads).
    v7x megacore: split into >=2 tiles only when there are at least two full
    256-row tiles of work, rounded to 256 so vreg/MXU tiles stay full."""
    b8 = _round_up(batch, 8)
    # bound the tm*hid_p f32 intermediates at large hid
    tm_cap = 256 if hid_p >= 2048 else (512 if multi_core else 1024)
    if multi_core and b8 >= 512:
        tm = min(tm_cap, max(256, _round_up(pl.cdiv(b8, 2), 256)))
    else:
        tm = min(tm_cap, b8)
    return _round_up(tm, 8)


def _vmem_limit_bytes(tm, d_in_p, hid_p, out_p, weight_bufs, c_item, o_item):
    weights = (d_in_p * hid_p + hid_p * hid_p + hid_p * out_p) * c_item * weight_bufs
    biases = (2 * hid_p + out_p) * 4 * weight_bufs
    io_tiles = 2 * tm * d_in_p * 4 + 2 * tm * out_p * o_item       # double-buffered x / out
    inter = tm * hid_p * (4 + c_item) * 2 + tm * out_p * 4         # h1,h2 (+bf16 casts) + y
    budget = int((weights + biases + io_tiles + inter) * 1.25)     # ~25% headroom
    return max(16 << 20, min(budget, 100 << 20))


def prepare_encoder_params(params, *, compute_dtype=jnp.bfloat16, align_256=None):
    """Pad feature dims to MXU-friendly sizes and cast weights to the MXU dtype.

    W3/b3 are packed per head: mu columns padded to z_dim_p, variance columns
    padded to z_dim_p, concatenated -> [hid_p, 2*z_dim_p]. Do this once and
    reuse the result across forward calls.
    """
    w1, b1, w2, b2, w3, b3 = params
    d_in, hid = w1.shape
    out_dim = w3.shape[1]
    z_dim = out_dim // 2
    assert out_dim == 2 * z_dim

    if align_256 is None:
        kind = _device_kind()
        align_256 = ("v6" in kind) or ("v7" in kind)   # 2x256x256 MXU generations

    d_in_p = _pad_feature(d_in, align_256)
    hid_p = _pad_feature(hid, align_256)
    z_dim_p = _round_up(z_dim, 128)     # store-side: keep per-head padding minimal
    out_p = 2 * z_dim_p

    def pad_w(w, r, c):
        return jnp.pad(w, ((0, r - w.shape[0]), (0, c - w.shape[1]))).astype(compute_dtype)

    def pad_b(b, c):
        b = b.reshape(1, -1)
        return jnp.pad(b, ((0, 0), (0, c - b.shape[1]))).astype(jnp.float32)

    w3p = jnp.concatenate([pad_w(w3[:, :z_dim], hid_p, z_dim_p),
                           pad_w(w3[:, z_dim:], hid_p, z_dim_p)], axis=1)
    b3p = jnp.concatenate([pad_b(b3[:z_dim], z_dim_p),
                           pad_b(b3[z_dim:], z_dim_p)], axis=1)

    padded = (pad_w(w1, d_in_p, hid_p), pad_b(b1, hid_p),
              pad_w(w2, hid_p, hid_p), pad_b(b2, hid_p),
              w3p, b3p)
    dims = dict(d_in=d_in, hid=hid, z_dim=z_dim,
                d_in_p=d_in_p, hid_p=hid_p, z_dim_p=z_dim_p, out_p=out_p)
    return padded, dims


def encoder_forward(x, padded_params, dims, *, z_dim, tm=None,
                    out_dtype=jnp.float32, vmem_limit_bytes=None):
    """x: [B, x_dim + n_cond] float32. Returns (mu [B, z_dim], variance [B, z_dim]).

    Set out_dtype=jnp.bfloat16 to halve the output writeback if downstream
    consumers tolerate it (softplus/+1e-6 stay f32 before the final cast)."""
    B, d_in = x.shape
    assert d_in == dims["d_in"]
    assert z_dim == dims["z_dim"]
    hid = dims["hid"]
    d_in_p, hid_p = dims["d_in_p"], dims["hid_p"]
    z_dim_p, out_p = dims["z_dim_p"], dims["out_p"]

    kind = _device_kind()
    multi_core = "v7" in kind            # v7x: 2 TensorCores per chip

    if tm is None:
        tm = _choose_tm(B, hid_p, multi_core)
    tm = _round_up(tm, 8)
    b_pad = _round_up(max(B, tm), tm)    # arbitrary batch: pad, never assert
    grid = (b_pad // tm,)

    # x stays f32 — no separate padded+bf16-cast copy materialized in HBM.
    x_p = x.astype(jnp.float32)
    if b_pad != B or d_in_p != d_in:
        x_p = jnp.pad(x_p, ((0, b_pad - B), (0, d_in_p - d_in)))

    w1p, b1p, w2p, b2p, w3p, b3p = padded_params
    c_item = jnp.dtype(w1p.dtype).itemsize
    o_item = jnp.dtype(out_dtype).itemsize

    row_map = lambda i: (i, 0)
    full_map = lambda i: (0, 0)

    cost = pl.CostEstimate(           # advisory only (erf/softplus counted as 1 each)
        flops=2 * B * (d_in * hid + hid * hid + hid * 2 * z_dim),
        transcendentals=B * (2 * hid + z_dim),
        bytes_accessed=(int(x_p.size) * 4
                        + sum(int(p.size) * p.dtype.itemsize for p in padded_params)
                        + b_pad * out_p * o_item),
    )

    def run(single_buffer_weights):
        if single_buffer_weights:
            # constant index_map -> nothing to pipeline; keep ONE copy resident
            wspec = lambda shape: pl.BlockSpec(shape, full_map,
                                               pipeline_mode=pl.Buffered(1))
        else:
            wspec = lambda shape: pl.BlockSpec(shape, full_map)
        bufs = 1 if single_buffer_weights else 2
        vmem = vmem_limit_bytes
        if vmem is None:
            vmem = _vmem_limit_bytes(tm, d_in_p, hid_p, out_p, bufs, c_item, o_item)
        return pl.pallas_call(
            functools.partial(encoder_kernel, z_dim_p=z_dim_p),
            out_shape=jax.ShapeDtypeStruct((b_pad, out_p), out_dtype),
            grid_spec=pltpu.PrefetchScalarGridSpec(
                num_scalar_prefetch=0,
                grid=grid,
                in_specs=[
                    pl.BlockSpec((tm, d_in_p), row_map),   # x tile (f32, cast in-kernel)
                    wspec((d_in_p, hid_p)),                # W1 (bf16, resident)
                    wspec((1, hid_p)),                     # b1 (f32)
                    wspec((hid_p, hid_p)),                 # W2 (bf16, resident)
                    wspec((1, hid_p)),                     # b2 (f32)
                    wspec((hid_p, out_p)),                 # W3 fused mu|var, per-head padded
                    wspec((1, out_p)),                     # b3 (f32)
                ],
                out_specs=pl.BlockSpec((tm, out_p), row_map),   # lane-dense output slab
            ),
            compiler_params=pltpu.CompilerParams(
                dimension_semantics=("parallel",),
                vmem_limit_bytes=vmem,
            ),
            cost_estimate=cost,
        )(x_p, w1p, b1p, w2p, b2p, w3p, b3p)

    try:
        out = run(single_buffer_weights=True)
    except Exception:
        # pl.Buffered(1) not supported by this jax/Mosaic build; fall back to
        # default double-buffering (perf-only difference, correctness identical).
        out = run(single_buffer_weights=False)

    mu = out[:B, :z_dim]                                 # starts at lane 0
    variance = out[:B, z_dim_p:z_dim_p + z_dim]          # starts on a 128-lane boundary
    return mu, variance


def init_encoder_params(key, x_dim, z_dim, n_cond, hid_dim):
    """Xavier-normal (gain=0.1) weights, zero biases, like init_weights()."""
    d_in = x_dim + n_cond

    def xavier(k, fan_in, fan_out, gain=0.1):
        std = gain * math.sqrt(2.0 / (fan_in + fan_out))
        return std * jax.random.normal(k, (fan_in, fan_out), dtype=jnp.float32)

    k1, k2, k3 = jax.random.split(key, 3)
    w1 = xavier(k1, d_in, hid_dim)
    b1 = jnp.zeros((hid_dim,), jnp.float32)
    w2 = xavier(k2, hid_dim, hid_dim)
    b2 = jnp.zeros((hid_dim,), jnp.float32)
    w3 = xavier(k3, hid_dim, 2 * z_dim)
    b3 = jnp.zeros((2 * z_dim,), jnp.float32)
    return (w1, b1, w2, b2, w3, b3)


def encoder_ref(x, params, z_dim, compute_dtype=jnp.float32):
    """Pure-JAX reference; compute_dtype=bf16 mirrors the kernel's operand casts."""
    w1, b1, w2, b2, w3, b3 = params
    cd = compute_dtype
    h1 = _gelu_exact(jnp.dot(x.astype(cd), w1.astype(cd),
                             preferred_element_type=jnp.float32) + b1)
    h2 = _gelu_exact(jnp.dot(h1.astype(cd), w2.astype(cd),
                             preferred_element_type=jnp.float32) + b2)
    y = jnp.dot(h2.astype(cd), w3.astype(cd),
                preferred_element_type=jnp.float32) + b3
    return y[:, :z_dim], _softplus(y[:, z_dim:]) + 1e-6


if __name__ == "__main__":
    # small shapes consistent with the module
    x_dim, n_cond, z_dim, hid_dim = 16, 4, 8, 32
    batch = 8

    key = jax.random.PRNGKey(0)
    kx, kp = jax.random.split(key)
    x = jax.random.normal(kx, (batch, x_dim + n_cond), dtype=jnp.float32)
    params = init_encoder_params(kp, x_dim, z_dim, n_cond, hid_dim)

    padded_params, dims = prepare_encoder_params(params, compute_dtype=jnp.bfloat16)
    mu, variance = encoder_forward(x, padded_params, dims, z_dim=z_dim)
    jax.block_until_ready((mu, variance))

    # bf16-matched reference (same operand casts, f32 accumulation): tight check
    mu_bf, var_bf = encoder_ref(x, params, z_dim, compute_dtype=jnp.bfloat16)
    # full-f32 reference: loose check (only bf16 operand rounding differs)
    mu_f32, var_f32 = encoder_ref(x, params, z_dim, compute_dtype=jnp.float32)

    assert mu.shape == (batch, z_dim) and variance.shape == (batch, z_dim)
    assert jnp.allclose(mu, mu_bf, atol=1e-5, rtol=1e-3)
    assert jnp.allclose(variance, var_bf, atol=1e-5, rtol=1e-3)
    assert jnp.allclose(mu, mu_f32, atol=2e-3, rtol=5e-2)
    assert jnp.allclose(variance, var_f32, atol=2e-3, rtol=5e-2)
    assert bool(jnp.all(variance > 0))

    print("KERNEL_OK")
</pallas_src>

<mosaic_0001>
module attributes {stable_mosaic.version = 11 : i64} {
  func.func @encoder_kernel(%arg0: i32, %arg1: memref<8x128xf32, #tpu.memory_space<vmem>>, %arg2: memref<128x128xbf16, #tpu.memory_space<vmem>>, %arg3: memref<1x128xf32, #tpu.memory_space<vmem>>, %arg4: memref<128x128xbf16, #tpu.memory_space<vmem>>, %arg5: memref<1x128xf32, #tpu.memory_space<vmem>>, %arg6: memref<128x256xbf16, #tpu.memory_space<vmem>>, %arg7: memref<1x256xf32, #tpu.memory_space<vmem>>, %arg8: memref<8x256xf32, #tpu.memory_space<vmem>>) attributes {dimension_semantics = [#tpu.dimension_semantics<parallel>], iteration_bounds = array<i64: 1>, scalar_prefetch = 0 : i64, scratch_operands = 0 : i64, tpu.core_type = #tpu.core_type<tc>, window_params = [{transform_indices = @transform_0, window_bounds = array<i64: 8, 128>}, {pipeline_mode = #tpu.pipeline_mode<synchronous>, transform_indices = @transform_1, window_bounds = array<i64: 128, 128>}, {pipeline_mode = #tpu.pipeline_mode<synchronous>, transform_indices = @transform_2, window_bounds = array<i64: 1, 128>}, {pipeline_mode = #tpu.pipeline_mode<synchronous>, transform_indices = @transform_3, window_bounds = array<i64: 128, 128>}, {pipeline_mode = #tpu.pipeline_mode<synchronous>, transform_indices = @transform_4, window_bounds = array<i64: 1, 128>}, {pipeline_mode = #tpu.pipeline_mode<synchronous>, transform_indices = @transform_5, window_bounds = array<i64: 128, 256>}, {pipeline_mode = #tpu.pipeline_mode<synchronous>, transform_indices = @transform_6, window_bounds = array<i64: 1, 256>}, {transform_indices = @transform_7, window_bounds = array<i64: 8, 256>}]} {
    %c0 = arith.constant 0 : index
    %c0_0 = arith.constant 0 : index
    %0 = vector.load %arg1[%c0, %c0_0] : memref<8x128xf32, #tpu.memory_space<vmem>>, vector<8x128xf32>
    %1 = arith.truncf %0 : vector<8x128xf32> to vector<8x128xbf16>
    %c0_1 = arith.constant 0 : index
    %c0_2 = arith.constant 0 : index
    %2 = vector.load %arg2[%c0_1, %c0_2] : memref<128x128xbf16, #tpu.memory_space<vmem>>, vector<128x128xbf16>
    %cst = arith.constant dense<0.000000e+00> : vector<8x128xf32>
    %3 = tpu.matmul %1, %2, %cst {dimension_numbers = #tpu.dot_dimension_numbers<[1], [0], [0], [1], [0, 0, 1, 1], [], []>} : vector<8x128xbf16>, vector<128x128xbf16>, vector<8x128xf32> -> vector<8x128xf32>
    %c0_3 = arith.constant 0 : index
    %c0_4 = arith.constant 0 : index
    %4 = vector.load %arg3[%c0_3, %c0_4] : memref<1x128xf32, #tpu.memory_space<vmem>>, vector<1x128xf32>
    %5 = vector.broadcast %4 : vector<1x128xf32> to vector<8x128xf32>
    %6 = arith.addf %3, %5 : vector<8x128xf32>
    %cst_5 = arith.constant 5.000000e-01 : f32
    %7 = vector.broadcast %cst_5 : f32 to vector<8x128xf32>
    %8 = arith.mulf %7, %6 : vector<8x128xf32>
    %cst_6 = arith.constant 0.707106769 : f32
    %9 = vector.broadcast %cst_6 : f32 to vector<8x128xf32>
    %10 = arith.mulf %6, %9 : vector<8x128xf32>
    %11 = math.erf %10 : vector<8x128xf32>
    %cst_7 = arith.constant 1.000000e+00 : f32
    %12 = vector.broadcast %cst_7 : f32 to vector<8x128xf32>
    %13 = arith.addf %12, %11 : vector<8x128xf32>
    %14 = arith.mulf %8, %13 : vector<8x128xf32>
    %15 = arith.truncf %14 : vector<8x128xf32> to vector<8x128xbf16>
    %c0_8 = arith.constant 0 : index
    %c0_9 = arith.constant 0 : index
    %16 = vector.load %arg4[%c0_8, %c0_9] : memref<128x128xbf16, #tpu.memory_space<vmem>>, vector<128x128xbf16>
    %cst_10 = arith.constant dense<0.000000e+00> : vector<8x128xf32>
    %17 = tpu.matmul %15, %16, %cst_10 {dimension_numbers = #tpu.dot_dimension_numbers<[1], [0], [0], [1], [0, 0, 1, 1], [], []>} : vector<8x128xbf16>, vector<128x128xbf16>, vector<8x128xf32> -> vector<8x128xf32>
    %c0_11 = arith.constant 0 : index
    %c0_12 = arith.constant 0 : index
    %18 = vector.load %arg5[%c0_11, %c0_12] : memref<1x128xf32, #tpu.memory_space<vmem>>, vector<1x128xf32>
    %19 = vector.broadcast %18 : vector<1x128xf32> to vector<8x128xf32>
    %20 = arith.addf %17, %19 : vector<8x128xf32>
    %cst_13 = arith.constant 5.000000e-01 : f32
    %21 = vector.broadcast %cst_13 : f32 to vector<8x128xf32>
    %22 = arith.mulf %21, %20 : vector<8x128xf32>
    %cst_14 = arith.constant 0.707106769 : f32
    %23 = vector.broadcast %cst_14 : f32 to vector<8x128xf32>
    %24 = arith.mulf %20, %23 : vector<8x128xf32>
    %25 = math.erf %24 : vector<8x128xf32>
    %cst_15 = arith.constant 1.000000e+00 : f32
    %26 = vector.broadcast %cst_15 : f32 to vector<8x128xf32>
    %27 = arith.addf %26, %25 : vector<8x128xf32>
    %28 = arith.mulf %22, %27 : vector<8x128xf32>
    %29 = arith.truncf %28 : vector<8x128xf32> to vector<8x128xbf16>
    %c0_16 = arith.constant 0 : index
    %c0_17 = arith.constant 0 : index
    %30 = vector.load %arg6[%c0_16, %c0_17] : memref<128x256xbf16, #tpu.memory_space<vmem>>, vector<128x256xbf16>
    %cst_18 = arith.constant dense<0.000000e+00> : vector<8x256xf32>
    %31 = tpu.matmul %29, %30, %cst_18 {dimension_numbers = #tpu.dot_dimension_numbers<[1], [0], [0], [1], [0, 0, 1, 1], [], []>} : vector<8x128xbf16>, vector<128x256xbf16>, vector<8x256xf32> -> vector<8x256xf32>
    %c0_19 = arith.constant 0 : index
    %c0_20 = arith.constant 0 : index
    %32 = vector.load %arg7[%c0_19, %c0_20] : memref<1x256xf32, #tpu.memory_space<vmem>>, vector<1x256xf32>
    %33 = vector.broadcast %32 : vector<1x256xf32> to vector<8x256xf32>
    %34 = arith.addf %31, %33 : vector<8x256xf32>
    %35 = vector.extract_strided_slice %34 {offsets = [0, 0], sizes = [8, 128], strides = [1, 1]} : vector<8x256xf32> to vector<8x128xf32>
    %c0_21 = arith.constant 0 : index
    %c0_22 = arith.constant 0 : index
    %36 = vector.load %arg8[%c0_21, %c0_22] : memref<8x256xf32, #tpu.memory_space<vmem>>, vector<8x128xf32>
    tpu.vector_store %arg8[%c0_21, %c0_22], %35 {strides = array<i32>} : memref<8x256xf32, #tpu.memory_space<vmem>>, vector<8x128xf32>,
    %37 = vector.extract_strided_slice %34 {offsets = [0, 128], sizes = [8, 128], strides = [1, 1]} : vector<8x256xf32> to vector<8x128xf32>
    %cst_23 = arith.constant 0.000000e+00 : f32
    %38 = vector.broadcast %cst_23 : f32 to vector<8x128xf32>
    %39 = arith.maximumf %37, %38 : vector<8x128xf32>
    %40 = math.absf %37 : vector<8x128xf32>
    %cst_24 = arith.constant 0.000000e+00 : f32
    %41 = vector.broadcast %cst_24 : f32 to vector<8x128xf32>
    %42 = arith.subf %41, %40 : vector<8x128xf32>
    %43 = math.exp %42 : vector<8x128xf32>
    %44 = math.log1p %43 : vector<8x128xf32>
    %45 = arith.addf %39, %44 : vector<8x128xf32>
    %cst_25 = arith.constant 9.99999997E-7 : f32
    %46 = vector.broadcast %cst_25 : f32 to vector<8x128xf32>
    %47 = arith.addf %45, %46 : vector<8x128xf32>
    %c0_26 = arith.constant 0 : index
    %c128 = arith.constant 128 : index
    %48 = vector.load %arg8[%c0_26, %c128] : memref<8x256xf32, #tpu.memory_space<vmem>>, vector<8x128xf32>
    tpu.vector_store %arg8[%c0_26, %c128], %47 {strides = array<i32>} : memref<8x256xf32, #tpu.memory_space<vmem>>, vector<8x128xf32>,
    return
  }
  func.func @transform_0(%arg0: i32) -> (i32, i32) {
    %c0_i32 = arith.constant 0 : i32
    %c0_i32_0 = arith.constant 0 : i32
    return %arg0, %c0_i32 : i32, i32
  }
  func.func @transform_1(%arg0: i32) -> (i32, i32) {
    %c0_i32 = arith.constant 0 : i32
    %c0_i32_0 = arith.constant 0 : i32
    %c0_i32_1 = arith.constant 0 : i32
    return %c0_i32, %c0_i32_0 : i32, i32
  }
  func.func @transform_2(%arg0: i32) -> (i32, i32) {
    %c0_i32 = arith.constant 0 : i32
    %c0_i32_0 = arith.constant 0 : i32
    %c0_i32_1 = arith.constant 0 : i32
    return %c0_i32, %c0_i32_0 : i32, i32
  }
  func.func @transform_3(%arg0: i32) -> (i32, i32) {
    %c0_i32 = arith.constant 0 : i32
    %c0_i32_0 = arith.constant 0 : i32
    %c0_i32_1 = arith.constant 0 : i32
    return %c0_i32, %c0_i32_0 : i32, i32
  }
  func.func @transform_4(%arg0: i32) -> (i32, i32) {
    %c0_i32 = arith.constant 0 : i32
    %c0_i32_0 = arith.constant 0 : i32
    %c0_i32_1 = arith.constant 0 : i32
    return %c0_i32, %c0_i32_0 : i32, i32
  }
  func.func @transform_5(%arg0: i32) -> (i32, i32) {
    %c0_i32 = arith.constant 0 : i32
    %c0_i32_0 = arith.constant 0 : i32
    %c0_i32_1 = arith.constant 0 : i32
    return %c0_i32, %c0_i32_0 : i32, i32
  }
  func.func @transform_6(%arg0: i32) -> (i32, i32) {
    %c0_i32 = arith.constant 0 : i32
    %c0_i32_0 = arith.constant 0 : i32
    %c0_i32_1 = arith.constant 0 : i32
    return %c0_i32, %c0_i32_0 : i32, i32
  }
  func.func @transform_7(%arg0: i32) -> (i32, i32) {
    %c0_i32 = arith.constant 0 : i32
    %c0_i32_0 = arith.constant 0 : i32
    return %arg0, %c0_i32 : i32, i32
  }
}

module attributes {stable_mosaic.version = 11 : i64} {
  func.func @encoder_kernel(%arg0: i32, %arg1: memref<8x128xf32, #tpu.memory_space<vmem>>, %arg2: memref<128x128xbf16, #tpu.memory_space<vmem>>, %arg3: memref<1x128xf32, #tpu.memory_space<vmem>>, %arg4: memref<128x128xbf16, #tpu.memory_space<vmem>>, %arg5: memref<1x128xf32, #tpu.memory_space<vmem>>, %arg6: memref<128x256xbf16, #tpu.memory_space<vmem>>, %arg7: memref<1x256xf32, #tpu.memory_space<vmem>>, %arg8: memref<8x256xf32, #tpu.memory_space<vmem>>) attributes {dimension_semantics = [#tpu.dimension_semantics<parallel>], iteration_bounds = array<i64: 1>, scalar_prefetch = 0 : i64, scratch_operands = 0 : i64, tpu.core_type = #tpu.core_type<tc>, window_params = [{transform_indices = @transform_0, window_bounds = array<i64: 8, 128>}, {pipeline_mode = #tpu.pipeline_mode<synchronous>, transform_indices = @transform_1, window_bounds = array<i64: 128, 128>}, {pipeline_mode = #tpu.pipeline_mode<synchronous>, transform_indices = @transform_2, window_bounds = array<i64: 1, 128>}, {pipeline_mode = #tpu.pipeline_mode<synchronous>, transform_indices = @transform_3, window_bounds = array<i64: 128, 128>}, {pipeline_mode = #tpu.pipeline_mode<synchronous>, transform_indices = @transform_4, window_bounds = array<i64: 1, 128>}, {pipeline_mode = #tpu.pipeline_mode<synchronous>, transform_indices = @transform_5, window_bounds = array<i64: 128, 256>}, {pipeline_mode = #tpu.pipeline_mode<synchronous>, transform_indices = @transform_6, window_bounds = array<i64: 1, 256>}, {transform_indices = @transform_7, window_bounds = array<i64: 8, 256>}]} {
    %c0 = arith.constant 0 : index
    %c0_0 = arith.constant 0 : index
    %0 = vector.load %arg1[%c0, %c0_0] : memref<8x128xf32, #tpu.memory_space<vmem>>, vector<8x128xf32>
    %1 = arith.truncf %0 : vector<8x128xf32> to vector<8x128xbf16>
    %c0_1 = arith.constant 0 : index
    %c0_2 = arith.constant 0 : index
    %2 = vector.load %arg2[%c0_1, %c0_2] : memref<128x128xbf16, #tpu.memory_space<vmem>>, vector<128x128xbf16>
    %cst = arith.constant dense<0.000000e+00> : vector<8x128xf32>
    %3 = tpu.matmul %1, %2, %cst {dimension_numbers = #tpu.dot_dimension_numbers<[1], [0], [0], [1], [0, 0, 1, 1], [], []>} : vector<8x128xbf16>, vector<128x128xbf16>, vector<8x128xf32> -> vector<8x128xf32>
    %c0_3 = arith.constant 0 : index
    %c0_4 = arith.constant 0 : index
    %4 = vector.load %arg3[%c0_3, %c0_4] : memref<1x128xf32, #tpu.memory_space<vmem>>, vector<1x128xf32>
    %5 = vector.broadcast %4 : vector<1x128xf32> to vector<8x128xf32>
    %6 = arith.addf %3, %5 : vector<8x128xf32>
    %cst_5 = arith.constant 5.000000e-01 : f32
    %7 = vector.broadcast %cst_5 : f32 to vector<8x128xf32>
    %8 = arith.mulf %7, %6 : vector<8x128xf32>
    %cst_6 = arith.constant 0.707106769 : f32
    %9 = vector.broadcast %cst_6 : f32 to vector<8x128xf32>
    %10 = arith.mulf %6, %9 : vector<8x128xf32>
    %11 = math.erf %10 : vector<8x128xf32>
    %cst_7 = arith.constant 1.000000e+00 : f32
    %12 = vector.broadcast %cst_7 : f32 to vector<8x128xf32>
    %13 = arith.addf %12, %11 : vector<8x128xf32>
    %14 = arith.mulf %8, %13 : vector<8x128xf32>
    %15 = arith.truncf %14 : vector<8x128xf32> to vector<8x128xbf16>
    %c0_8 = arith.constant 0 : index
    %c0_9 = arith.constant 0 : index
    %16 = vector.load %arg4[%c0_8, %c0_9] : memref<128x128xbf16, #tpu.memory_space<vmem>>, vector<128x128xbf16>
    %cst_10 = arith.constant dense<0.000000e+00> : vector<8x128xf32>
    %17 = tpu.matmul %15, %16, %cst_10 {dimension_numbers = #tpu.dot_dimension_numbers<[1], [0], [0], [1], [0, 0, 1, 1], [], []>} : vector<8x128xbf16>, vector<128x128xbf16>, vector<8x128xf32> -> vector<8x128xf32>
    %c0_11 = arith.constant 0 : index
    %c0_12 = arith.constant 0 : index
    %18 = vector.load %arg5[%c0_11, %c0_12] : memref<1x128xf32, #tpu.memory_space<vmem>>, vector<1x128xf32>
    %19 = vector.broadcast %18 : vector<1x128xf32> to vector<8x128xf32>
    %20 = arith.addf %17, %19 : vector<8x128xf32>
    %cst_13 = arith.constant 5.000000e-01 : f32
    %21 = vector.broadcast %cst_13 : f32 to vector<8x128xf32>
    %22 = arith.mulf %21, %20 : vector<8x128xf32>
    %cst_14 = arith.constant 0.707106769 : f32
    %23 = vector.broadcast %cst_14 : f32 to vector<8x128xf32>
    %24 = arith.mulf %20, %23 : vector<8x128xf32>
    %25 = math.erf %24 : vector<8x128xf32>
    %cst_15 = arith.constant 1.000000e+00 : f32
    %26 = vector.broadcast %cst_15 : f32 to vector<8x128xf32>
    %27 = arith.addf %26, %25 : vector<8x128xf32>
    %28 = arith.mulf %22, %27 : vector<8x128xf32>
    %29 = arith.truncf %28 : vector<8x128xf32> to vector<8x128xbf16>
    %c0_16 = arith.constant 0 : index
    %c0_17 = arith.constant 0 : index
    %30 = vector.load %arg6[%c0_16, %c0_17] : memref<128x256xbf16, #tpu.memory_space<vmem>>, vector<128x256xbf16>
    %cst_18 = arith.constant dense<0.000000e+00> : vector<8x256xf32>
    %31 = tpu.matmul %29, %30, %cst_18 {dimension_numbers = #tpu.dot_dimension_numbers<[1], [0], [0], [1], [0, 0, 1, 1], [], []>} : vector<8x128xbf16>, vector<128x256xbf16>, vector<8x256xf32> -> vector<8x256xf32>
    %c0_19 = arith.constant 0 : index
    %c0_20 = arith.constant 0 : index
    %32 = vector.load %arg7[%c0_19, %c0_20] : memref<1x256xf32, #tpu.memory_space<vmem>>, vector<1x256xf32>
    %33 = vector.broadcast %32 : vector<1x256xf32> to vector<8x256xf32>
    %34 = arith.addf %31, %33 : vector<8x256xf32>
    %35 = vector.extract_strided_slice %34 {offsets = [0, 0], sizes = [8, 128], strides = [1, 1]} : vector<8x256xf32> to vector<8x128xf32>
    %c0_21 = arith.constant 0 : index
    %c0_22 = arith.constant 0 : index
    %36 = vector.load %arg8[%c0_21, %c0_22] : memref<8x256xf32, #tpu.memory_space<vmem>>, vector<8x128xf32>
    tpu.vector_store %arg8[%c0_21, %c0_22], %35 {strides = array<i32>} : memref<8x256xf32, #tpu.memory_space<vmem>>, vector<8x128xf32>,
    %37 = vector.extract_strided_slice %34 {offsets = [0, 128], sizes = [8, 128], strides = [1, 1]} : vector<8x256xf32> to vector<8x128xf32>
    %cst_23 = arith.constant 0.000000e+00 : f32
    %38 = vector.broadcast %cst_23 : f32 to vector<8x128xf32>
    %39 = arith.maximumf %37, %38 : vector<8x128xf32>
    %40 = math.absf %37 : vector<8x128xf32>
    %cst_24 = arith.constant 0.000000e+00 : f32
    %41 = vector.broadcast %cst_24 : f32 to vector<8x128xf32>
    %42 = arith.subf %41, %40 : vector<8x128xf32>
    %43 = math.exp %42 : vector<8x128xf32>
    %44 = math.log1p %43 : vector<8x128xf32>
    %45 = arith.addf %39, %44 : vector<8x128xf32>
    %cst_25 = arith.constant 9.99999997E-7 : f32
    %46 = vector.broadcast %cst_25 : f32 to vector<8x128xf32>
    %47 = arith.addf %45, %46 : vector<8x128xf32>
    %c0_26 = arith.constant 0 : index
    %c128 = arith.constant 128 : index
    %48 = vector.load %arg8[%c0_26, %c128] : memref<8x256xf32, #tpu.memory_space<vmem>>, vector<8x128xf32>
    tpu.vector_store %arg8[%c0_26, %c128], %47 {strides = array<i32>} : memref<8x256xf32, #tpu.memory_space<vmem>>, vector<8x128xf32>,
    return
  }
  func.func @transform_0(%arg0: i32) -> (i32, i32) {
    %c0_i32 = arith.constant 0 : i32
    %c0_i32_0 = arith.constant 0 : i32
    return %arg0, %c0_i32 : i32, i32
  }
  func.func @transform_1(%arg0: i32) -> (i32, i32) {
    %c0_i32 = arith.constant 0 : i32
    %c0_i32_0 = arith.constant 0 : i32
    %c0_i32_1 = arith.constant 0 : i32
    return %c0_i32, %c0_i32_0 : i32, i32
  }
  func.func @transform_2(%arg0: i32) -> (i32, i32) {
    %c0_i32 = arith.constant 0 : i32
    %c0_i32_0 = arith.constant 0 : i32
    %c0_i32_1 = arith.constant 0 : i32
    return %c0_i32, %c0_i32_0 : i32, i32
  }
  func.func @transform_3(%arg0: i32) -> (i32, i32) {
    %c0_i32 = arith.constant 0 : i32
    %c0_i32_0 = arith.constant 0 : i32
    %c0_i32_1 = arith.constant 0 : i32
    return %c0_i32, %c0_i32_0 : i32, i32
  }
  func.func @transform_4(%arg0: i32) -> (i32, i32) {
    %c0_i32 = arith.constant 0 : i32
    %c0_i32_0 = arith.constant 0 : i32
    %c0_i32_1 = arith.constant 0 : i32
    return %c0_i32, %c0_i32_0 : i32, i32
  }
  func.func @transform_5(%arg0: i32) -> (i32, i32) {
    %c0_i32 = arith.constant 0 : i32
    %c0_i32_0 = arith.constant 0 : i32
    %c0_i32_1 = arith.constant 0 : i32
    return %c0_i32, %c0_i32_0 : i32, i32
  }
  func.func @transform_6(%arg0: i32) -> (i32, i32) {
    %c0_i32 = arith.constant 0 : i32
    %c0_i32_0 = arith.constant 0 : i32
    %c0_i32_1 = arith.constant 0 : i32
    return %c0_i32, %c0_i32_0 : i32, i32
  }
  func.func @transform_7(%arg0: i32) -> (i32, i32) {
    %c0_i32 = arith.constant 0 : i32
    %c0_i32_0 = arith.constant 0 : i32
    return %arg0, %c0_i32 : i32, i32
  }
}

</mosaic_0001>

<bundles_post_ra>
// kernel: tpu_custom_call.1
= control target key start
LH: loop header
LB: loop body
LE: loop exit
PB: predicated region body
PF: predicated region fallthrough
CT: control target
= control target key end

     0   :  { %12 = vsyncpa [#allocation3], 0  ;;  %s898_s0 = inlined_call_operand.hbm [shape: f32[8,128], index: 0, kind: input, shape index: {}]   ;;  %s899_s1 = inlined_call_operand.hbm [shape: bf16[128,128], index: 1, kind: input, shape index: {}]   ;;  %s900_s2 = inlined_call_operand.vmem [shape: f32[1,128], index: 2, kind: input, shape index: {}]   ;;  %s901_s3 = inlined_call_operand.hbm [shape: bf16[128,128], index: 3, kind: input, shape index: {}]   ;;  %s902_s4 = inlined_call_operand.vmem [shape: f32[1,128], index: 4, kind: input, shape index: {}]   ;;  %s903_s5 = inlined_call_operand.hbm [shape: bf16[128,256], index: 5, kind: input, shape index: {}]   ;;  %s904_s6 = inlined_call_operand.vmem [shape: f32[1,256], index: 6, kind: input, shape index: {}]   ;;  %s905_s7 = inlined_call_operand.hbm [shape: f32[8,256], index: 7, kind: output, shape index: {}]  }
   0x1   :  { %13 = vsyncpa [#allocation6], 0 }
   0x2   :  { %14 = vsyncpa [#allocation9], 0 }
   0x3   :  { %15 = vsyncpa [#allocation4], 0  ;;  %s771_s24 = smov [#allocation5]   ;;  %s653_s28 = scalar_lea.hbm %s899_s1, 1024 }
   0x4   :  { %s31_s25 = sshll.u32 %s771_s24, 4  ;;  %p654_p0 = scmp.ne.s32.totalorder %s899_s1, %s653_s28  ;;  %s32_s25 = int_to_ptr.vmem [resolvable:$true] %s31_s25 }
   0x5   :  { %p657_p1 = scmp.lt.u32.totalorder %s653_s28, %s899_s1 }
   0x7   :  { %p659_p2 = pnand %p657_p1, %p654_p0 }
   0x9   :  { %662 = shalt.err (!%p659_p2)
}
   0xa   :  { %s663_s10 = scalar_lea.vmem %s32_s25, 1024  ;;  %p668_p4 = scmp.lt.s32.totalorder %s32_s25, %s32_s25 }
   0xb   :  { %p664_p3 = scmp.ne.s32.totalorder %s32_s25, %s663_s10  ;;  %p669_p5 = scmp.lt.s32.totalorder %s663_s10, %s663_s10 }
   0xd   :  { %p670_p6 = por %p669_p5, %p668_p4 }
   0xf   :  { %p671_p7 = pnand %p670_p6, %p664_p3 }
  0x11   :  { %674 = shalt.err (!%p671_p7)
}
  0x12   :  { %s772_s11 = smov 64   ;;  %s773_s12 = smov 4  }
  0x13   :  { %37 = dma.hbm_to_vmem [thread:$0]  %s899_s1, 1024, %s32_s25, [#allocation6], %s772_s11, %s772_s11, %s773_s12  }
  0x14   :  { %s774_s15 = smov [#allocation2]   ;;  %s775_s17 = smov [#allocation7]  }
  0x15   :  { %s22_s16 = sshll.u32 %s774_s15, 4  ;;  %s45_s18 = sshll.u32 %s775_s17, 4  ;;  %s23_s16 = int_to_ptr.vmem [resolvable:$true] %s22_s16  ;;  %s46_s18 = int_to_ptr.vmem [resolvable:$true] %s45_s18 }
  0x16   :  { %s675_s21 = scalar_lea.hbm %s898_s0, 128 }
  0x17   :  { %p676_p8 = scmp.ne.s32.totalorder %s898_s0, %s675_s21  ;;  %p679_p9 = scmp.lt.u32.totalorder %s675_s21, %s898_s0 }
  0x19   :  { %p681_p10 = pnand %p679_p9, %p676_p8 }
  0x1b   :  { %684 = shalt.err (!%p681_p10)
}
  0x1c   :  { %s685_s1 = scalar_lea.vmem %s23_s16, 128  ;;  %p690_p12 = scmp.lt.s32.totalorder %s23_s16, %s23_s16 }
  0x1d   :  { %p686_p11 = scmp.ne.s32.totalorder %s23_s16, %s685_s1  ;;  %p691_p13 = scmp.lt.s32.totalorder %s685_s1, %s685_s1 }
  0x1f   :  { %p692_p0 = por %p691_p13, %p690_p12 }
  0x21   :  { %p693_p1 = pnand %p692_p0, %p686_p11 }
  0x23   :  { %696 = shalt.err (!%p693_p1)
}
  0x24   :  { %25 = dma.hbm_to_vmem [thread:$0]  %s898_s0, 128, %s23_s16, [#allocation3]  }
  0x25   :  { %s697_s30 = scalar_lea.hbm %s901_s3, 1024 }
  0x26   :  { %p698_p2 = scmp.ne.s32.totalorder %s901_s3, %s697_s30  ;;  %p701_p3 = scmp.lt.u32.totalorder %s697_s30, %s901_s3 }
  0x28   :  { %p703_p4 = pnand %p701_p3, %p698_p2 }
  0x2a   :  { %706 = shalt.err (!%p703_p4)
}
  0x2b   :  { %s707_s14 = scalar_lea.vmem %s46_s18, 1024  ;;  %p712_p6 = scmp.lt.s32.totalorder %s46_s18, %s46_s18 }
  0x2c   :  { %p708_p5 = scmp.ne.s32.totalorder %s46_s18, %s707_s14  ;;  %p713_p7 = scmp.lt.s32.totalorder %s707_s14, %s707_s14 }
  0x2e   :  { %p714_p8 = por %p713_p7, %p712_p6 }
  0x30   :  { %p715_p9 = pnand %p714_p8, %p708_p5 }
  0x32   :  { %718 = shalt.err (!%p715_p9)
}
  0x33   :  { %51 = dma.hbm_to_vmem [thread:$0]  %s901_s3, 1024, %s46_s18, [#allocation6], %s772_s11, %s772_s11, %s773_s12  }
  0x34   :  { %s776_s16 = smov [#allocation8]   ;;  %s719_s21 = scalar_lea.hbm %s903_s5, 2048 }
  0x35   :  { %s59_s17 = sshll.u32 %s776_s16, 4  ;;  %p720_p10 = scmp.ne.s32.totalorder %s903_s5, %s719_s21  ;;  %s60_s17 = int_to_ptr.vmem [resolvable:$true] %s59_s17 }
  0x36   :  { %p723_p11 = scmp.lt.u32.totalorder %s719_s21, %s903_s5 }
  0x38   :  { %p725_p12 = pnand %p723_p11, %p720_p10 }
  0x3a   :  { %728 = shalt.err (!%p725_p12)
}
  0x3b   :  { %s729_s1 = scalar_lea.vmem %s60_s17, 2048  ;;  %p734_p0 = scmp.lt.s32.totalorder %s60_s17, %s60_s17 }
  0x3c   :  { %p730_p13 = scmp.ne.s32.totalorder %s60_s17, %s729_s1  ;;  %p735_p1 = scmp.lt.s32.totalorder %s729_s1, %s729_s1 }
  0x3e   :  { %p736_p2 = por %p735_p1, %p734_p0 }
  0x40   :  { %p737_p3 = pnand %p736_p2, %p730_p13 }
  0x42   :  { %740 = shalt.err (!%p737_p3)
}
  0x43   :  { %s777_s3 = smov 128   ;;  %s778_s11 = smov 8  }
  0x44   :  { %65 = dma.hbm_to_vmem [thread:$0]  %s903_s5, 2048, %s60_s17, [#allocation9], %s777_s3, %s777_s3, %s778_s11  }
  0x45   :  { %763 = dma.done.wait [#allocation3], 128  }
  0x46   :  { %764 = vsyncadd [#allocation3], 4294967168 }
  0x47   :  { %765 = dma.done.wait [#allocation6], 2048  }
  0x48   :  { %766 = vsyncadd [#allocation6], 4294965248 }
  0x49   :  { %767 = dma.done.wait [#allocation9], 2048  }
  0x4a   :  { %768 = vsyncadd [#allocation9], 4294965248  ;;  %v779_v0 = vmov 0.0   ;;  %vm780_vm0 = vmmov 0   ;;  %v605_v1 = vld [vmem:[#allocation5] sm:$0xff]   ;;  %v606_v2 = vld [vmem:[#allocation5 + $0x8] sm:$0xff]   ;;  %v335_v60 = vlaneseq }
  0x4b   :  { %553 = vmatprep.subr.bf16.mxu0 %v779_v0  ;;  %569 = vmatprep.mubr.msk.bf16.mxu0 %vm780_vm0, %v779_v0  ;;  %v607_v3 = vld [vmem:[#allocation5 + $0x10] sm:$0xff]   ;;  %v613_v4 = vld [vmem:[#allocation7] sm:$0xff]   ;;  %v608_v5 = vld [vmem:[#allocation5 + $0x18] sm:$0xff]   ;;  %v781_v47 = vmov 0  }
  0x4c   :  { %573 = vmatprep.subr.bf16.mxu1 %v779_v0  ;;  %589 = vmatprep.mubr.msk.bf16.mxu1 %vm780_vm0, %v779_v0  ;;  %v614_v6 = vld [vmem:[#allocation7 + $0x8] sm:$0xff]   ;;  %v609_v7 = vld [vmem:[#allocation5 + $0x20] sm:$0xff]   ;;  %v615_v8 = vld [vmem:[#allocation7 + $0x10] sm:$0xff]   ;;  %v336_v61 = vshrl.u32 %v335_v60, 7 }
  0x4d   :  { %554 = vmatpush3.bf16.msra.mxu0 %v605_v1  ;;  %574 = vmatpush3.bf16.msra.mxu1 %v613_v4  ;;  %v610_v9 = vld [vmem:[#allocation5 + $0x28] sm:$0xff]   ;;  %v611_v10 = vld [vmem:[#allocation5 + $0x30] sm:$0xff]   ;;  %v612_v11 = vld [vmem:[#allocation5 + $0x38] sm:$0xff]  }
  0x4e   :  { %555 = vmatprep.subr.bf16.mxu0 %v779_v0  ;;  %575 = vmatprep.subr.bf16.mxu1 %v779_v0  ;;  %v81_v12 = vld [vmem:[#allocation2] sm:$0xff]  ;;  %v617_v15 = vld [vmem:[#allocation7 + $0x20] sm:$0xff]   ;;  %v618_v16 = vld [vmem:[#allocation7 + $0x28] sm:$0xff]   ;;  %v337_v62 = vsub.s32 0, %v336_v61 }
  0x4f   :  { %v82_v13 = vpack.c.bf16 %v81_v12, %v81_v12  ;;  %v616_v14 = vld [vmem:[#allocation7 + $0x18] sm:$0xff]   ;;  %v619_v17 = vld [vmem:[#allocation7 + $0x30] sm:$0xff]   ;;  %v621_v19 = vld [vmem:[#allocation8] ss:$8 sps:$4 sm:$0xff]  }
  0x50   :  { %v620_v18 = vld [vmem:[#allocation7 + $0x38] sm:$0xff]   ;;  %v623_v20 = vld [vmem:[#allocation8 + $0x4] ss:$8 sps:$4 sm:$0xff]   ;;  %v627_v24 = vld [vmem:[#allocation8 + $0x20] ss:$8 sps:$4 sm:$0xff]  }
  0x51   :  { %556 = vmatpush3.bf16.msra.mxu0 %v606_v2  ;;  %576 = vmatpush3.bf16.msra.mxu1 %v614_v6  ;;  %v626_v21 = vld [vmem:[#allocation8 + $0x14] ss:$8 sps:$4 sm:$0xff]   ;;  %v624_v22 = vld [vmem:[#allocation8 + $0x10] ss:$8 sps:$4 sm:$0xff]   ;;  %v629_v23 = vld [vmem:[#allocation8 + $0x24] ss:$8 sps:$4 sm:$0xff]  }
  0x52   :  { %557 = vmatprep.subr.bf16.mxu0 %v779_v0  ;;  %577 = vmatprep.subr.bf16.mxu1 %v779_v0  ;;  %v501_v25 = vld [vmem:[%s900_s2] ss:$0 sm:$0xff]  ;;  %v632_v37 = vld [vmem:[#allocation8 + $0x34] ss:$8 sps:$4 sm:$0xff]   ;;  %v635_v39 = vld [vmem:[#allocation8 + $0x44] ss:$8 sps:$4 sm:$0xff]  }
  0x53   :  { %v630_v38 = vld [vmem:[#allocation8 + $0x30] ss:$8 sps:$4 sm:$0xff]   ;;  %v633_v40 = vld [vmem:[#allocation8 + $0x40] ss:$8 sps:$4 sm:$0xff]   ;;  %v638_v41 = vld [vmem:[#allocation8 + $0x54] ss:$8 sps:$4 sm:$0xff]  }
  0x54   :  { %v636_v42 = vld [vmem:[#allocation8 + $0x50] ss:$8 sps:$4 sm:$0xff]   ;;  %v641_v43 = vld [vmem:[#allocation8 + $0x64] ss:$8 sps:$4 sm:$0xff]   ;;  %v639_v44 = vld [vmem:[#allocation8 + $0x60] ss:$8 sps:$4 sm:$0xff]  }
  0x55   :  { %558 = vmatpush3.bf16.msra.mxu0 %v607_v3  ;;  %578 = vmatpush3.bf16.msra.mxu1 %v615_v8  ;;  %v644_v45 = vld [vmem:[#allocation8 + $0x74] ss:$8 sps:$4 sm:$0xff]   ;;  %v642_v46 = vld [vmem:[#allocation8 + $0x70] ss:$8 sps:$4 sm:$0xff]  }
  0x56   :  { %559 = vmatprep.subr.bf16.mxu0 %v779_v0  ;;  %579 = vmatprep.subr.bf16.mxu1 %v779_v0  ;;  %v510_v48 = vld [vmem:[%s902_s4] ss:$0 sm:$0xff]  ;;  %s782_s4 = smov [#allocation10]  }
  0x57   :  { %v333_v63 = vld [vmem:[%s904_s6] sm:$0x3]  ;;  %s490_s6 = sshll.u32 %s782_s4, 4  ;;  %s491_s6 = int_to_ptr.vmem [resolvable:$true] %s490_s6 }
  0x58   :  { %v338_v1 = vrot.slane %v333_v63, %v337_v62  ;;  %s741_s30 = scalar_lea.vmem %s491_s6, 256  ;;  %p746_p5 = scmp.lt.s32.totalorder %s491_s6, %s491_s6 }
  0x59   :  { %560 = vmatpush3.bf16.msra.mxu0 %v608_v5  ;;  %580 = vmatpush3.bf16.msra.mxu1 %v616_v14  ;;  %p742_p4 = scmp.ne.s32.totalorder %s491_s6, %s741_s30  ;;  %p747_p6 = scmp.lt.s32.totalorder %s741_s30, %s741_s30 }
  0x5a   :  { %561 = vmatprep.subr.bf16.mxu0 %v779_v0  ;;  %581 = vmatprep.subr.bf16.mxu1 %v779_v0 }
  0x5b   :  { %p748_p7 = por %p747_p6, %p746_p5 }
  0x5d   :  { %562 = vmatpush3.bf16.msra.mxu0 %v609_v7  ;;  %582 = vmatpush3.bf16.msra.mxu1 %v617_v15  ;;  %p749_p8 = pnand %p748_p7, %p742_p4 }
  0x5e   :  { %563 = vmatprep.subr.bf16.mxu0 %v779_v0  ;;  %583 = vmatprep.subr.bf16.mxu1 %v779_v0 }
  0x61   :  { %564 = vmatpush3.bf16.msra.mxu0 %v610_v9  ;;  %584 = vmatpush3.bf16.msra.mxu1 %v618_v16 }
  0x62   :  { %565 = vmatprep.subr.bf16.mxu0 %v779_v0  ;;  %585 = vmatprep.subr.bf16.mxu1 %v779_v0 }
  0x65   :  { %566 = vmatpush3.bf16.msra.mxu0 %v611_v10  ;;  %586 = vmatpush3.bf16.msra.mxu1 %v619_v17 }
  0x66   :  { %567 = vmatprep.subr.bf16.mxu0 %v779_v0  ;;  %587 = vmatprep.subr.bf16.mxu1 %v779_v0  ;;  %v341_v0 = vsub.s32 1, %v336_v61 }
  0x68   :  { %v342_v2 = vrot.slane %v333_v63, %v341_v0 }
  0x69   :  { %568 = vmatpush3.bf16.msra.mxu0 %v612_v11  ;;  %588 = vmatpush3.bf16.msra.mxu1 %v620_v18 }
  0x6a   :  { %425 = vmatprep.subr.bf16.mxu0 %v623_v20 }
  0x6c   :  { %570 = vmatmul.mubr.bf16.vlgmr.msra.gmra.mrb[0].mxu0 %v82_v13 }
  0x6d   :  { %426 = vmatpush1.bf16.msra.mxu0 %v621_v19  ;;  %457 = vmatprep.mubr.bf16.mxu0 %v781_v47 }
  0x6e   :  { %427 = vmatprep.subr.bf16.mxu0 %v626_v21 }
  0x71   :  { %428 = vmatpush1.bf16.msra.mxu0 %v624_v22 }
  0x72   :  { %429 = vmatprep.subr.bf16.mxu0 %v629_v23 }
  0x75   :  { %430 = vmatpush1.bf16.msra.mxu0 %v627_v24 }
  0x76   :  { %431 = vmatprep.subr.bf16.mxu0 %v632_v37 }
  0x79   :  { %432 = vmatpush1.bf16.msra.mxu0 %v630_v38 }
  0x7a   :  { %433 = vmatprep.subr.bf16.mxu0 %v635_v39 }
  0x7d   :  { %434 = vmatpush1.bf16.msra.mxu0 %v633_v40 }
  0x7e   :  { %435 = vmatprep.subr.bf16.mxu0 %v638_v41 }
  0x81   :  { %436 = vmatpush1.bf16.msra.mxu0 %v636_v42 }
  0x82   :  { %437 = vmatprep.subr.bf16.mxu0 %v641_v43 }
  0x85   :  { %438 = vmatpush1.bf16.msra.mxu0 %v639_v44 }
  0x86   :  { %439 = vmatprep.subr.bf16.mxu0 %v644_v45 }
  0x89   :  { %440 = vmatpush1.bf16.msra.mxu0 %v642_v46 }
 0x13f   :  { %v188_v26 = vpop.f32.mrb[0].mxu0 }
 0x140   :  { %v189_v27 = vadd.f32 %v501_v25, %v188_v26  ;;  %v571_v28 = vpop.f32.mrb[1].mxu0 }
 0x141   :  { %v191_v29 = vpop.f32.mrb[2].mxu0 }
 0x142   :  { %v195_v30 = vmul.f32 0.70710677, %v189_v27  ;;  %v572_v31 = vpop.f32.mrb[3].mxu0  ;;  %v194_v33 = vmul.f32 0.5, %v189_v27 }
 0x144   :  { %645 = verf.f32 %v195_v30 }
 0x14e   :  { %v646_v32 = vpop.eup %645 }
 0x14f   :  { %v197_v34 = vadd.f32 1.0, %v646_v32 }
 0x151   :  { %v198_v35 = vmul.f32 %v197_v34, %v194_v33 }
 0x153   :  { %v199_v36 = vpack.c.bf16 %v198_v35, %v198_v35 }
 0x155   :  { %590 = vmatmul.mubr.bf16.vlgmr.msra.gmra.mrb[0].mxu1 %v199_v36 }
 0x228   :  { %v305_v49 = vpop.f32.mrb[0].mxu1 }
 0x229   :  { %v306_v50 = vadd.f32 %v510_v48, %v305_v49  ;;  %v591_v51 = vpop.f32.mrb[1].mxu1 }
 0x22a   :  { %v308_v52 = vpop.f32.mrb[2].mxu1 }
 0x22b   :  { %v312_v53 = vmul.f32 0.70710677, %v306_v50  ;;  %v592_v54 = vpop.f32.mrb[3].mxu1  ;;  %v311_v56 = vmul.f32 0.5, %v306_v50 }
 0x22d   :  { %647 = verf.f32 %v312_v53 }
 0x237   :  { %v648_v55 = vpop.eup %647 }
 0x238   :  { %v314_v57 = vadd.f32 1.0, %v648_v55 }
 0x23a   :  { %v315_v58 = vmul.f32 %v314_v57, %v311_v56 }
 0x23c   :  { %v316_v59 = vpack.c.bf16 %v315_v58, %v315_v58 }
 0x23e   :  { %458 = vmatmul.mubr.bf16.vlgmr.msra.gmra.mrb[4].mxu0 %v316_v59 }
 0x311   :  { %v459_v3 = vpop.f32.mrb[4].mxu0 }
 0x312   :  { %v460_v4 = vadd.f32 %v459_v3, %v338_v1  ;;  %v461_v5 = vpop.f32.mrb[5].mxu0 }
 0x313   :  { %v462_v6 = vadd.f32 %v461_v5, %v342_v2  ;;  %v463_v7 = vpop.f32.mrb[6].mxu0 }
 0x314   :  { %466 = vst [vmem:[#allocation10] sm:$0xff] %v460_v4  ;;  %v464_v8 = vpop.f32.mrb[7].mxu0 }
 0x315   :  { %v468_v9 = vand.u32 2147483647, %v462_v6  ;;  %v467_v20 = vmax.f32 %v462_v6, 0.0 }
 0x317   :  { %v469_v10 = vsub.f32 0.0, %v468_v9 }
 0x319   :  { %v470_v11 = vmul.f32 1.442695, %v469_v10 }
 0x31b   :  { %649 = vpow2.f32 %v470_v11 }
 0x325   :  { %v650_v12 = vpop.eup %649 }
 0x326   :  { %v472_v13 = vadd.f32 1.0, %v650_v12  ;;  %v475_v14 = vmul.f32 -0.5, %v650_v12  ;;  %v478_v16 = vand.u32 2147483647, %v650_v12 }
 0x328   :  { %651 = vlog2.f32 %v472_v13  ;;  %v476_v15 = vadd.f32 1.0, %v475_v14  ;;  %vm479_vm1 = vcmp.lt.f32.partialorder %v478_v16, 0.0004427343 }
 0x32a   :  { %v477_v19 = vmul.f32 %v650_v12, %v476_v15 }
 0x332   :  { %v652_v17 = vpop.eup %651 }
 0x333   :  { %v474_v18 = vmul.f32 0.6931472, %v652_v17 }
 0x335   :  { %v480_v21 = vsel %vm479_vm1, %v477_v19, %v474_v18 }
 0x336   :  { %v481_v22 = vadd.f32 %v480_v21, %v467_v20 }
 0x338   :  { %v482_v23 = vadd.f32 1e-06, %v481_v22 }
 0x33a   :  { %483 = vst [vmem:[#allocation10 + $0x8] sm:$0xff] %v482_v23 }
 0x33b   :  { %752 = shalt.err (!%p749_p8)
}
 0x33c   :  { %s753_s10 = scalar_lea.hbm %s905_s7, 256 }
 0x33d   :  { %p754_p9 = scmp.ne.s32.totalorder %s905_s7, %s753_s10  ;;  %p757_p10 = scmp.lt.u32.totalorder %s753_s10, %s905_s7 }
 0x33f   :  { %p759_p11 = pnand %p757_p10, %p754_p9 }
 0x341   :  { %762 = shalt.err (!%p759_p11)
}
 0x342   :  { %493 = dma.vmem_to_hbm [thread:$0]  %s491_s6, 256, %s905_s7, [#allocation4]  }
 0x343   :  { %769 = dma.done.wait [#allocation4], 256  }
 0x344   :  { %770 = vsyncadd [#allocation4], 4294967040 }
 0x345   :  { %497 = vsyncpa [#allocation3], 1 }
 0x346   :  { %498 = vsyncpa [#allocation6], 1 }
 0x347   :  { %499 = vsyncpa [#allocation9], 1 }
 0x348   :  { %500 = vsyncpa [#allocation4], 1 }

// kernel: tpu_custom_call.1
= control target key start
LH: loop header
LB: loop body
LE: loop exit
PB: predicated region body
PF: predicated region fallthrough
CT: control target
= control target key end

     0   :  { %12 = vsyncpa [#allocation3], 0  ;;  %s898_s0 = inlined_call_operand.hbm [shape: f32[8,128], index: 0, kind: input, shape index: {}]   ;;  %s899_s1 = inlined_call_operand.hbm [shape: bf16[128,128], index: 1, kind: input, shape index: {}]   ;;  %s900_s2 = inlined_call_operand.vmem [shape: f32[1,128], index: 2, kind: input, shape index: {}]   ;;  %s901_s3 = inlined_call_operand.hbm [shape: bf16[128,128], index: 3, kind: input, shape index: {}]   ;;  %s902_s4 = inlined_call_operand.vmem [shape: f32[1,128], index: 4, kind: input, shape index: {}]   ;;  %s903_s5 = inlined_call_operand.hbm [shape: bf16[128,256], index: 5, kind: input, shape index: {}]   ;;  %s904_s6 = inlined_call_operand.vmem [shape: f32[1,256], index: 6, kind: input, shape index: {}]   ;;  %s905_s7 = inlined_call_operand.hbm [shape: f32[8,256], index: 7, kind: output, shape index: {}]  }
   0x1   :  { %13 = vsyncpa [#allocation6], 0 }
   0x2   :  { %14 = vsyncpa [#allocation9], 0 }
   0x3   :  { %15 = vsyncpa [#allocation4], 0  ;;  %s771_s24 = smov [#allocation5]   ;;  %s653_s28 = scalar_lea.hbm %s899_s1, 1024 }
   0x4   :  { %s31_s25 = sshll.u32 %s771_s24, 4  ;;  %p654_p0 = scmp.ne.s32.totalorder %s899_s1, %s653_s28  ;;  %s32_s25 = int_to_ptr.vmem [resolvable:$true] %s31_s25 }
   0x5   :  { %p657_p1 = scmp.lt.u32.totalorder %s653_s28, %s899_s1 }
   0x7   :  { %p659_p2 = pnand %p657_p1, %p654_p0 }
   0x9   :  { %662 = shalt.err (!%p659_p2)
}
   0xa   :  { %s663_s10 = scalar_lea.vmem %s32_s25, 1024  ;;  %p668_p4 = scmp.lt.s32.totalorder %s32_s25, %s32_s25 }
   0xb   :  { %p664_p3 = scmp.ne.s32.totalorder %s32_s25, %s663_s10  ;;  %p669_p5 = scmp.lt.s32.totalorder %s663_s10, %s663_s10 }
   0xd   :  { %p670_p6 = por %p669_p5, %p668_p4 }
   0xf   :  { %p671_p7 = pnand %p670_p6, %p664_p3 }
  0x11   :  { %674 = shalt.err (!%p671_p7)
}
  0x12   :  { %s772_s11 = smov 64   ;;  %s773_s12 = smov 4  }
  0x13   :  { %37 = dma.hbm_to_vmem [thread:$0]  %s899_s1, 1024, %s32_s25, [#allocation6], %s772_s11, %s772_s11, %s773_s12  }
  0x14   :  { %s774_s15 = smov [#allocation2]   ;;  %s775_s17 = smov [#allocation7]  }
  0x15   :  { %s22_s16 = sshll.u32 %s774_s15, 4  ;;  %s45_s18 = sshll.u32 %s775_s17, 4  ;;  %s23_s16 = int_to_ptr.vmem [resolvable:$true] %s22_s16  ;;  %s46_s18 = int_to_ptr.vmem [resolvable:$true] %s45_s18 }
  0x16   :  { %s675_s21 = scalar_lea.hbm %s898_s0, 128 }
  0x17   :  { %p676_p8 = scmp.ne.s32.totalorder %s898_s0, %s675_s21  ;;  %p679_p9 = scmp.lt.u32.totalorder %s675_s21, %s898_s0 }
  0x19   :  { %p681_p10 = pnand %p679_p9, %p676_p8 }
  0x1b   :  { %684 = shalt.err (!%p681_p10)
}
  0x1c   :  { %s685_s1 = scalar_lea.vmem %s23_s16, 128  ;;  %p690_p12 = scmp.lt.s32.totalorder %s23_s16, %s23_s16 }
  0x1d   :  { %p686_p11 = scmp.ne.s32.totalorder %s23_s16, %s685_s1  ;;  %p691_p13 = scmp.lt.s32.totalorder %s685_s1, %s685_s1 }
  0x1f   :  { %p692_p0 = por %p691_p13, %p690_p12 }
  0x21   :  { %p693_p1 = pnand %p692_p0, %p686_p11 }
  0x23   :  { %696 = shalt.err (!%p693_p1)
}
  0x24   :  { %25 = dma.hbm_to_vmem [thread:$0]  %s898_s0, 128, %s23_s16, [#allocation3]  }
  0x25   :  { %s697_s30 = scalar_lea.hbm %s901_s3, 1024 }
  0x26   :  { %p698_p2 = scmp.ne.s32.totalorder %s901_s3, %s697_s30  ;;  %p701_p3 = scmp.lt.u32.totalorder %s697_s30, %s901_s3 }
  0x28   :  { %p703_p4 = pnand %p701_p3, %p698_p2 }
  0x2a   :  { %706 = shalt.err (!%p703_p4)
}
  0x2b   :  { %s707_s14 = scalar_lea.vmem %s46_s18, 1024  ;;  %p712_p6 = scmp.lt.s32.totalorder %s46_s18, %s46_s18 }
  0x2c   :  { %p708_p5 = scmp.ne.s32.totalorder %s46_s18, %s707_s14  ;;  %p713_p7 = scmp.lt.s32.totalorder %s707_s14, %s707_s14 }
  0x2e   :  { %p714_p8 = por %p713_p7, %p712_p6 }
  0x30   :  { %p715_p9 = pnand %p714_p8, %p708_p5 }
  0x32   :  { %718 = shalt.err (!%p715_p9)
}
  0x33   :  { %51 = dma.hbm_to_vmem [thread:$0]  %s901_s3, 1024, %s46_s18, [#allocation6], %s772_s11, %s772_s11, %s773_s12  }
  0x34   :  { %s776_s16 = smov [#allocation8]   ;;  %s719_s21 = scalar_lea.hbm %s903_s5, 2048 }
  0x35   :  { %s59_s17 = sshll.u32 %s776_s16, 4  ;;  %p720_p10 = scmp.ne.s32.totalorder %s903_s5, %s719_s21  ;;  %s60_s17 = int_to_ptr.vmem [resolvable:$true] %s59_s17 }
  0x36   :  { %p723_p11 = scmp.lt.u32.totalorder %s719_s21, %s903_s5 }
  0x38   :  { %p725_p12 = pnand %p723_p11, %p720_p10 }
  0x3a   :  { %728 = shalt.err (!%p725_p12)
}
  0x3b   :  { %s729_s1 = scalar_lea.vmem %s60_s17, 2048  ;;  %p734_p0 = scmp.lt.s32.totalorder %s60_s17, %s60_s17 }
  0x3c   :  { %p730_p13 = scmp.ne.s32.totalorder %s60_s17, %s729_s1  ;;  %p735_p1 = scmp.lt.s32.totalorder %s729_s1, %s729_s1 }
  0x3e   :  { %p736_p2 = por %p735_p1, %p734_p0 }
  0x40   :  { %p737_p3 = pnand %p736_p2, %p730_p13 }
  0x42   :  { %740 = shalt.err (!%p737_p3)
}
  0x43   :  { %s777_s3 = smov 128   ;;  %s778_s11 = smov 8  }
  0x44   :  { %65 = dma.hbm_to_vmem [thread:$0]  %s903_s5, 2048, %s60_s17, [#allocation9], %s777_s3, %s777_s3, %s778_s11  }
  0x45   :  { %763 = dma.done.wait [#allocation3], 128  }
  0x46   :  { %764 = vsyncadd [#allocation3], 4294967168 }
  0x47   :  { %765 = dma.done.wait [#allocation6], 2048  }
  0x48   :  { %766 = vsyncadd [#allocation6], 4294965248 }
  0x49   :  { %767 = dma.done.wait [#allocation9], 2048  }
  0x4a   :  { %768 = vsyncadd [#allocation9], 4294965248  ;;  %v779_v0 = vmov 0.0   ;;  %vm780_vm0 = vmmov 0   ;;  %v605_v1 = vld [vmem:[#allocation5] sm:$0xff]   ;;  %v606_v2 = vld [vmem:[#allocation5 + $0x8] sm:$0xff]   ;;  %v335_v60 = vlaneseq }
  0x4b   :  { %553 = vmatprep.subr.bf16.mxu0 %v779_v0  ;;  %569 = vmatprep.mubr.msk.bf16.mxu0 %vm780_vm0, %v779_v0  ;;  %v607_v3 = vld [vmem:[#allocation5 + $0x10] sm:$0xff]   ;;  %v613_v4 = vld [vmem:[#allocation7] sm:$0xff]   ;;  %v608_v5 = vld [vmem:[#allocation5 + $0x18] sm:$0xff]   ;;  %v781_v47 = vmov 0  }
  0x4c   :  { %573 = vmatprep.subr.bf16.mxu1 %v779_v0  ;;  %589 = vmatprep.mubr.msk.bf16.mxu1 %vm780_vm0, %v779_v0  ;;  %v614_v6 = vld [vmem:[#allocation7 + $0x8] sm:$0xff]   ;;  %v609_v7 = vld [vmem:[#allocation5 + $0x20] sm:$0xff]   ;;  %v615_v8 = vld [vmem:[#allocation7 + $0x10] sm:$0xff]   ;;  %v336_v61 = vshrl.u32 %v335_v60, 7 }
  0x4d   :  { %554 = vmatpush3.bf16.msra.mxu0 %v605_v1  ;;  %574 = vmatpush3.bf16.msra.mxu1 %v613_v4  ;;  %v610_v9 = vld [vmem:[#allocation5 + $0x28] sm:$0xff]   ;;  %v611_v10 = vld [vmem:[#allocation5 + $0x30] sm:$0xff]   ;;  %v612_v11 = vld [vmem:[#allocation5 + $0x38] sm:$0xff]  }
  0x4e   :  { %555 = vmatprep.subr.bf16.mxu0 %v779_v0  ;;  %575 = vmatprep.subr.bf16.mxu1 %v779_v0  ;;  %v81_v12 = vld [vmem:[#allocation2] sm:$0xff]  ;;  %v617_v15 = vld [vmem:[#allocation7 + $0x20] sm:$0xff]   ;;  %v618_v16 = vld [vmem:[#allocation7 + $0x28] sm:$0xff]   ;;  %v337_v62 = vsub.s32 0, %v336_v61 }
  0x4f   :  { %v82_v13 = vpack.c.bf16 %v81_v12, %v81_v12  ;;  %v616_v14 = vld [vmem:[#allocation7 + $0x18] sm:$0xff]   ;;  %v619_v17 = vld [vmem:[#allocation7 + $0x30] sm:$0xff]   ;;  %v621_v19 = vld [vmem:[#allocation8] ss:$8 sps:$4 sm:$0xff]  }
  0x50   :  { %v620_v18 = vld [vmem:[#allocation7 + $0x38] sm:$0xff]   ;;  %v623_v20 = vld [vmem:[#allocation8 + $0x4] ss:$8 sps:$4 sm:$0xff]   ;;  %v627_v24 = vld [vmem:[#allocation8 + $0x20] ss:$8 sps:$4 sm:$0xff]  }
  0x51   :  { %556 = vmatpush3.bf16.msra.mxu0 %v606_v2  ;;  %576 = vmatpush3.bf16.msra.mxu1 %v614_v6  ;;  %v626_v21 = vld [vmem:[#allocation8 + $0x14] ss:$8 sps:$4 sm:$0xff]   ;;  %v624_v22 = vld [vmem:[#allocation8 + $0x10] ss:$8 sps:$4 sm:$0xff]   ;;  %v629_v23 = vld [vmem:[#allocation8 + $0x24] ss:$8 sps:$4 sm:$0xff]  }
  0x52   :  { %557 = vmatprep.subr.bf16.mxu0 %v779_v0  ;;  %577 = vmatprep.subr.bf16.mxu1 %v779_v0  ;;  %v501_v25 = vld [vmem:[%s900_s2] ss:$0 sm:$0xff]  ;;  %v632_v37 = vld [vmem:[#allocation8 + $0x34] ss:$8 sps:$4 sm:$0xff]   ;;  %v635_v39 = vld [vmem:[#allocation8 + $0x44] ss:$8 sps:$4 sm:$0xff]  }
  0x53   :  { %v630_v38 = vld [vmem:[#allocation8 + $0x30] ss:$8 sps:$4 sm:$0xff]   ;;  %v633_v40 = vld [vmem:[#allocation8 + $0x40] ss:$8 sps:$4 sm:$0xff]   ;;  %v638_v41 = vld [vmem:[#allocation8 + $0x54] ss:$8 sps:$4 sm:$0xff]  }
  0x54   :  { %v636_v42 = vld [vmem:[#allocation8 + $0x50] ss:$8 sps:$4 sm:$0xff]   ;;  %v641_v43 = vld [vmem:[#allocation8 + $0x64] ss:$8 sps:$4 sm:$0xff]   ;;  %v639_v44 = vld [vmem:[#allocation8 + $0x60] ss:$8 sps:$4 sm:$0xff]  }
  0x55   :  { %558 = vmatpush3.bf16.msra.mxu0 %v607_v3  ;;  %578 = vmatpush3.bf16.msra.mxu1 %v615_v8  ;;  %v644_v45 = vld [vmem:[#allocation8 + $0x74] ss:$8 sps:$4 sm:$0xff]   ;;  %v642_v46 = vld [vmem:[#allocation8 + $0x70] ss:$8 sps:$4 sm:$0xff]  }
  0x56   :  { %559 = vmatprep.subr.bf16.mxu0 %v779_v0  ;;  %579 = vmatprep.subr.bf16.mxu1 %v779_v0  ;;  %v510_v48 = vld [vmem:[%s902_s4] ss:$0 sm:$0xff]  ;;  %s782_s4 = smov [#allocation10]  }
  0x57   :  { %v333_v63 = vld [vmem:[%s904_s6] sm:$0x3]  ;;  %s490_s6 = sshll.u32 %s782_s4, 4  ;;  %s491_s6 = int_to_ptr.vmem [resolvable:$true] %s490_s6 }
  0x58   :  { %v338_v1 = vrot.slane %v333_v63, %v337_v62  ;;  %s741_s30 = scalar_lea.vmem %s491_s6, 256  ;;  %p746_p5 = scmp.lt.s32.totalorder %s491_s6, %s491_s6 }
  0x59   :  { %560 = vmatpush3.bf16.msra.mxu0 %v608_v5  ;;  %580 = vmatpush3.bf16.msra.mxu1 %v616_v14  ;;  %p742_p4 = scmp.ne.s32.totalorder %s491_s6, %s741_s30  ;;  %p747_p6 = scmp.lt.s32.totalorder %s741_s30, %s741_s30 }
  0x5a   :  { %561 = vmatprep.subr.bf16.mxu0 %v779_v0  ;;  %581 = vmatprep.subr.bf16.mxu1 %v779_v0 }
  0x5b   :  { %p748_p7 = por %p747_p6, %p746_p5 }
  0x5d   :  { %562 = vmatpush3.bf16.msra.mxu0 %v609_v7  ;;  %582 = vmatpush3.bf16.msra.mxu1 %v617_v15  ;;  %p749_p8 = pnand %p748_p7, %p742_p4 }
  0x5e   :  { %563 = vmatprep.subr.bf16.mxu0 %v779_v0  ;;  %583 = vmatprep.subr.bf16.mxu1 %v779_v0 }
  0x61   :  { %564 = vmatpush3.bf16.msra.mxu0 %v610_v9  ;;  %584 = vmatpush3.bf16.msra.mxu1 %v618_v16 }
  0x62   :  { %565 = vmatprep.subr.bf16.mxu0 %v779_v0  ;;  %585 = vmatprep.subr.bf16.mxu1 %v779_v0 }
  0x65   :  { %566 = vmatpush3.bf16.msra.mxu0 %v611_v10  ;;  %586 = vmatpush3.bf16.msra.mxu1 %v619_v17 }
  0x66   :  { %567 = vmatprep.subr.bf16.mxu0 %v779_v0  ;;  %587 = vmatprep.subr.bf16.mxu1 %v779_v0  ;;  %v341_v0 = vsub.s32 1, %v336_v61 }
  0x68   :  { %v342_v2 = vrot.slane %v333_v63, %v341_v0 }
  0x69   :  { %568 = vmatpush3.bf16.msra.mxu0 %v612_v11  ;;  %588 = vmatpush3.bf16.msra.mxu1 %v620_v18 }
  0x6a   :  { %425 = vmatprep.subr.bf16.mxu0 %v623_v20 }
  0x6c   :  { %570 = vmatmul.mubr.bf16.vlgmr.msra.gmra.mrb[0].mxu0 %v82_v13 }
  0x6d   :  { %426 = vmatpush1.bf16.msra.mxu0 %v621_v19  ;;  %457 = vmatprep.mubr.bf16.mxu0 %v781_v47 }
  0x6e   :  { %427 = vmatprep.subr.bf16.mxu0 %v626_v21 }
  0x71   :  { %428 = vmatpush1.bf16.msra.mxu0 %v624_v22 }
  0x72   :  { %429 = vmatprep.subr.bf16.mxu0 %v629_v23 }
  0x75   :  { %430 = vmatpush1.bf16.msra.mxu0 %v627_v24 }
  0x76   :  { %431 = vmatprep.subr.bf16.mxu0 %v632_v37 }
  0x79   :  { %432 = vmatpush1.bf16.msra.mxu0 %v630_v38 }
  0x7a   :  { %433 = vmatprep.subr.bf16.mxu0 %v635_v39 }
  0x7d   :  { %434 = vmatpush1.bf16.msra.mxu0 %v633_v40 }
  0x7e   :  { %435 = vmatprep.subr.bf16.mxu0 %v638_v41 }
  0x81   :  { %436 = vmatpush1.bf16.msra.mxu0 %v636_v42 }
  0x82   :  { %437 = vmatprep.subr.bf16.mxu0 %v641_v43 }
  0x85   :  { %438 = vmatpush1.bf16.msra.mxu0 %v639_v44 }
  0x86   :  { %439 = vmatprep.subr.bf16.mxu0 %v644_v45 }
  0x89   :  { %440 = vmatpush1.bf16.msra.mxu0 %v642_v46 }
 0x13f   :  { %v188_v26 = vpop.f32.mrb[0].mxu0 }
 0x140   :  { %v189_v27 = vadd.f32 %v501_v25, %v188_v26  ;;  %v571_v28 = vpop.f32.mrb[1].mxu0 }
 0x141   :  { %v191_v29 = vpop.f32.mrb[2].mxu0 }
 0x142   :  { %v195_v30 = vmul.f32 0.70710677, %v189_v27  ;;  %v572_v31 = vpop.f32.mrb[3].mxu0  ;;  %v194_v33 = vmul.f32 0.5, %v189_v27 }
 0x144   :  { %645 = verf.f32 %v195_v30 }
 0x14e   :  { %v646_v32 = vpop.eup %645 }
 0x14f   :  { %v197_v34 = vadd.f32 1.0, %v646_v32 }
 0x151   :  { %v198_v35 = vmul.f32 %v197_v34, %v194_v33 }
 0x153   :  { %v199_v36 = vpack.c.bf16 %v198_v35, %v198_v35 }
 0x155   :  { %590 = vmatmul.mubr.bf16.vlgmr.msra.gmra.mrb[0].mxu1 %v199_v36 }
 0x228   :  { %v305_v49 = vpop.f32.mrb[0].mxu1 }
 0x229   :  { %v306_v50 = vadd.f32 %v510_v48, %v305_v49  ;;  %v591_v51 = vpop.f32.mrb[1].mxu1 }
 0x22a   :  { %v308_v52 = vpop.f32.mrb[2].mxu1 }
 0x22b   :  { %v312_v53 = vmul.f32 0.70710677, %v306_v50  ;;  %v592_v54 = vpop.f32.mrb[3].mxu1  ;;  %v311_v56 = vmul.f32 0.5, %v306_v50 }
 0x22d   :  { %647 = verf.f32 %v312_v53 }
 0x237   :  { %v648_v55 = vpop.eup %647 }
 0x238   :  { %v314_v57 = vadd.f32 1.0, %v648_v55 }
 0x23a   :  { %v315_v58 = vmul.f32 %v314_v57, %v311_v56 }
 0x23c   :  { %v316_v59 = vpack.c.bf16 %v315_v58, %v315_v58 }
 0x23e   :  { %458 = vmatmul.mubr.bf16.vlgmr.msra.gmra.mrb[4].mxu0 %v316_v59 }
 0x311   :  { %v459_v3 = vpop.f32.mrb[4].mxu0 }
 0x312   :  { %v460_v4 = vadd.f32 %v459_v3, %v338_v1  ;;  %v461_v5 = vpop.f32.mrb[5].mxu0 }
 0x313   :  { %v462_v6 = vadd.f32 %v461_v5, %v342_v2  ;;  %v463_v7 = vpop.f32.mrb[6].mxu0 }
 0x314   :  { %466 = vst [vmem:[#allocation10] sm:$0xff] %v460_v4  ;;  %v464_v8 = vpop.f32.mrb[7].mxu0 }
 0x315   :  { %v468_v9 = vand.u32 2147483647, %v462_v6  ;;  %v467_v20 = vmax.f32 %v462_v6, 0.0 }
 0x317   :  { %v469_v10 = vsub.f32 0.0, %v468_v9 }
 0x319   :  { %v470_v11 = vmul.f32 1.442695, %v469_v10 }
 0x31b   :  { %649 = vpow2.f32 %v470_v11 }
 0x325   :  { %v650_v12 = vpop.eup %649 }
 0x326   :  { %v472_v13 = vadd.f32 1.0, %v650_v12  ;;  %v475_v14 = vmul.f32 -0.5, %v650_v12  ;;  %v478_v16 = vand.u32 2147483647, %v650_v12 }
 0x328   :  { %651 = vlog2.f32 %v472_v13  ;;  %v476_v15 = vadd.f32 1.0, %v475_v14  ;;  %vm479_vm1 = vcmp.lt.f32.partialorder %v478_v16, 0.0004427343 }
 0x32a   :  { %v477_v19 = vmul.f32 %v650_v12, %v476_v15 }
 0x332   :  { %v652_v17 = vpop.eup %651 }
 0x333   :  { %v474_v18 = vmul.f32 0.6931472, %v652_v17 }
 0x335   :  { %v480_v21 = vsel %vm479_vm1, %v477_v19, %v474_v18 }
 0x336   :  { %v481_v22 = vadd.f32 %v480_v21, %v467_v20 }
 0x338   :  { %v482_v23 = vadd.f32 1e-06, %v481_v22 }
 0x33a   :  { %483 = vst [vmem:[#allocation10 + $0x8] sm:$0xff] %v482_v23 }
 0x33b   :  { %752 = shalt.err (!%p749_p8)
}
 0x33c   :  { %s753_s10 = scalar_lea.hbm %s905_s7, 256 }
 0x33d   :  { %p754_p9 = scmp.ne.s32.totalorder %s905_s7, %s753_s10  ;;  %p757_p10 = scmp.lt.u32.totalorder %s753_s10, %s905_s7 }
 0x33f   :  { %p759_p11 = pnand %p757_p10, %p754_p9 }
 0x341   :  { %762 = shalt.err (!%p759_p11)
}
 0x342   :  { %493 = dma.vmem_to_hbm [thread:$0]  %s491_s6, 256, %s905_s7, [#allocation4]  }
 0x343   :  { %769 = dma.done.wait [#allocation4], 256  }
 0x344   :  { %770 = vsyncadd [#allocation4], 4294967040 }
 0x345   :  { %497 = vsyncpa [#allocation3], 1 }
 0x346   :  { %498 = vsyncpa [#allocation6], 1 }
 0x347   :  { %499 = vsyncpa [#allocation9], 1 }
 0x348   :  { %500 = vsyncpa [#allocation4], 1 }

</bundles_post_ra>
